<compile_context>
chip_gen: v5e
topology: v5e:2x2
jax: 0.10.0
libtpu: 0.0.40
codegen_flags: <defaults>
</compile_context>

<pallas_src>
import jax
import jax.numpy as jnp
from jax.experimental import pallas as pl
from jax.experimental.pallas import tpu as pltpu


def _fdiv_kernel(x_ref, y_ref, o_ref):
    # PyTorch: x = x / 2; y = y / 2; x = x / y
    # *0.5 is bit-identical to /2 for IEEE floats and is a single VPU op.
    xh = x_ref[...] * 0.5
    yh = y_ref[...] * 0.5
    o_ref[...] = xh / yh


def fdiv(x, y, *, lane_cols=512, target_block_rows=1024):
    """Elementwise FDiv forward. x and y must have identical shapes/dtypes."""
    assert x.shape == y.shape and x.dtype == y.dtype
    orig_shape = x.shape
    total = x.size
    itemsize = jnp.dtype(x.dtype).itemsize

    # --- lane-dense 2D view: (rows, lane_cols) with lane_cols % 128 == 0 ---
    cols = lane_cols
    rows = pl.cdiv(total, cols)

    # Row tile: ~2 MiB per input block for f32 (1024 x 512), smaller if the
    # whole array is smaller.  target_block_rows is a multiple of 8, so either
    # tr == target_block_rows (aligned) or tr == rows == full dim (allowed).
    tr = min(target_block_rows, rows)
    grid_rows = pl.cdiv(rows, tr)
    padded_rows = grid_rows * tr
    padded_total = padded_rows * cols
    pad = padded_total - total

    xf = x.reshape(-1)
    yf = y.reshape(-1)
    if pad:
        # Pad y with 1.0 so the (discarded) padded lanes don't produce NaNs.
        xf = jnp.pad(xf, (0, pad))
        yf = jnp.pad(yf, (0, pad), constant_values=1)
    x2 = xf.reshape(padded_rows, cols)
    y2 = yf.reshape(padded_rows, cols)

    cost = pl.CostEstimate(
        flops=3 * total,
        transcendentals=0,
        bytes_accessed=3 * total * itemsize,
    )

    out = pl.pallas_call(
        _fdiv_kernel,
        out_shape=jax.ShapeDtypeStruct((padded_rows, cols), x.dtype),
        grid_spec=pltpu.PrefetchScalarGridSpec(
            num_scalar_prefetch=0,
            grid=(grid_rows,),
            in_specs=[
                pl.BlockSpec((tr, cols), lambda i: (i, 0)),
                pl.BlockSpec((tr, cols), lambda i: (i, 0)),
            ],
            out_specs=pl.BlockSpec((tr, cols), lambda i: (i, 0)),
        ),
        compiler_params=pltpu.CompilerParams(
            dimension_semantics=("parallel",),
        ),
        cost_estimate=cost,
    )(x2, y2)

    return out.reshape(-1)[:total].reshape(orig_shape)


if __name__ == "__main__":
    key = jax.random.PRNGKey(0)
    kx, ky = jax.random.split(key)
    shape = (2, 4, 16, 16)  # NCHW, consistent with the PyTorch test
    x = jax.random.normal(kx, shape, dtype=jnp.float32)
    # Keep y away from zero to avoid inf/nan in the example run.
    y = jax.random.normal(ky, shape, dtype=jnp.float32) + 3.0

    out = fdiv(x, y)
    out = jax.block_until_ready(out)

    # Reference check (pure JAX, same semantics as the PyTorch module).
    ref = (x / 2) / (y / 2)
    assert jnp.allclose(out, ref, rtol=1e-6, atol=1e-6), "mismatch vs reference"
    print("KERNEL_OK")
</pallas_src>

<mosaic_0001>
module attributes {stable_mosaic.version = 11 : i64} {
  func.func @_fdiv_kernel(%arg0: i32, %arg1: memref<4x512xf32, #tpu.memory_space<vmem>>, %arg2: memref<4x512xf32, #tpu.memory_space<vmem>>, %arg3: memref<4x512xf32, #tpu.memory_space<vmem>>) attributes {dimension_semantics = [#tpu.dimension_semantics<parallel>], iteration_bounds = array<i64: 1>, scalar_prefetch = 0 : i64, scratch_operands = 0 : i64, tpu.core_type = #tpu.core_type<tc>, window_params = [{transform_indices = @transform_0, window_bounds = array<i64: 4, 512>}, {transform_indices = @transform_1, window_bounds = array<i64: 4, 512>}, {transform_indices = @transform_2, window_bounds = array<i64: 4, 512>}]} {
    %c0 = arith.constant 0 : index
    %c0_0 = arith.constant 0 : index
    %0 = vector.load %arg1[%c0, %c0_0] : memref<4x512xf32, #tpu.memory_space<vmem>>, vector<4x512xf32>
    %cst = arith.constant 5.000000e-01 : f32
    %1 = vector.broadcast %cst : f32 to vector<4x512xf32>
    %2 = arith.mulf %0, %1 : vector<4x512xf32>
    %c0_1 = arith.constant 0 : index
    %c0_2 = arith.constant 0 : index
    %3 = vector.load %arg2[%c0_1, %c0_2] : memref<4x512xf32, #tpu.memory_space<vmem>>, vector<4x512xf32>
    %cst_3 = arith.constant 5.000000e-01 : f32
    %4 = vector.broadcast %cst_3 : f32 to vector<4x512xf32>
    %5 = arith.mulf %3, %4 : vector<4x512xf32>
    %6 = arith.divf %2, %5 : vector<4x512xf32>
    %c0_4 = arith.constant 0 : index
    %c0_5 = arith.constant 0 : index
    %7 = vector.load %arg3[%c0_4, %c0_5] : memref<4x512xf32, #tpu.memory_space<vmem>>, vector<4x512xf32>
    tpu.vector_store %arg3[%c0_4, %c0_5], %6 {strides = array<i32>} : memref<4x512xf32, #tpu.memory_space<vmem>>, vector<4x512xf32>,
    return
  }
  func.func @transform_0(%arg0: i32) -> (i32, i32) {
    %c0_i32 = arith.constant 0 : i32
    %c0_i32_0 = arith.constant 0 : i32
    return %arg0, %c0_i32 : i32, i32
  }
  func.func @transform_1(%arg0: i32) -> (i32, i32) {
    %c0_i32 = arith.constant 0 : i32
    %c0_i32_0 = arith.constant 0 : i32
    return %arg0, %c0_i32 : i32, i32
  }
  func.func @transform_2(%arg0: i32) -> (i32, i32) {
    %c0_i32 = arith.constant 0 : i32
    %c0_i32_0 = arith.constant 0 : i32
    return %arg0, %c0_i32 : i32, i32
  }
}

</mosaic_0001>

<bundles_post_ra>
// kernel: tpu_custom_call.1
= control target key start
LH: loop header
LB: loop body
LE: loop exit
PB: predicated region body
PF: predicated region fallthrough
CT: control target
= control target key end

     0   :  { %7 = vsyncpa [#allocation3], 0  ;;  %s216_s0 = inlined_call_operand.hbm [shape: f32[4,512], index: 0, kind: input, shape index: {}]   ;;  %s217_s1 = inlined_call_operand.hbm [shape: f32[4,512], index: 1, kind: input, shape index: {}]   ;;  %s218_s2 = inlined_call_operand.hbm [shape: f32[4,512], index: 2, kind: output, shape index: {}]  }
   0x1   :  { %8 = vsyncpa [#allocation6], 0 }
   0x2   :  { %9 = vsyncpa [#allocation4], 0  ;;  %s15_s11 = sshll.u32 %s216_s0, 4  ;;  %s183_s12 = smov [#allocation2]   ;;  %s16_s11 = int_to_ptr.hbm [resolvable:$true] %s15_s11 }
   0x3   :  { %s17_s13 = sshll.u32 %s183_s12, 4  ;;  %s26_s16 = sshll.u32 %s217_s1, 4  ;;  %s18_s13 = int_to_ptr.vmem [resolvable:$true] %s17_s13  ;;  %s27_s16 = int_to_ptr.hbm [resolvable:$true] %s26_s16 }
   0x4   :  { %20 = dma.hbm_to_vmem [thread:$0]  %s16_s11, 256, %s18_s13, [#allocation3]  }
   0x5   :  { %s184_s17 = smov [#allocation5]  }
   0x6   :  { %s28_s18 = sshll.u32 %s184_s17, 4  ;;  %s29_s18 = int_to_ptr.vmem [resolvable:$true] %s28_s18 }
   0x7   :  { %31 = dma.hbm_to_vmem [thread:$0]  %s27_s16, 256, %s29_s18, [#allocation6]  }
   0x8   :  { %177 = dma.done.wait [#allocation3], 256  }
   0x9   :  { %178 = vsyncadd [#allocation3], 4294967040 }
   0xa   :  { %179 = dma.done.wait [#allocation6], 256  }
   0xb   :  { %180 = vsyncadd [#allocation6], 4294967040  ;;  %v44_v0 = vld [vmem:[#allocation5] sm:$0xff]  ;;  %v45_v2 = vld [vmem:[#allocation5 + $0x8] sm:$0xff]  ;;  %s185_s0 = smov [#allocation7]   ;;  %s87_s21 = sshll.u32 %s218_s2, 4  ;;  %s88_s21 = int_to_ptr.hbm [resolvable:$true] %s87_s21 }
   0xc   :  { %v46_v1 = vmul.f32 0.5, %v44_v0  ;;  %v47_v3 = vmul.f32 0.5, %v45_v2  ;;  %v40_v12 = vld [vmem:[#allocation2] sm:$0xff]  ;;  %v41_v16 = vld [vmem:[#allocation2 + $0x8] sm:$0xff]  ;;  %s85_s1 = sshll.u32 %s185_s0, 4  ;;  %s86_s1 = int_to_ptr.vmem [resolvable:$true] %s85_s1 }
   0xd   :  { %v42_v20 = vmul.f32 0.5, %v40_v12  ;;  %v43_v23 = vmul.f32 0.5, %v41_v16 }
   0xe   :  { %101 = vrcp.f32 %v46_v1  ;;  %vm53_vm0 = vweird.f32 %v46_v1  ;;  %v59_v7 = vand.u32 2147483648, %v46_v1  ;;  %v57_v10 = vand.u32 2147483647, %v46_v1 }
   0xf   :  { %103 = vrcp.f32 %v47_v3  ;;  %v74_v11 = vand.u32 2147483648, %v47_v3  ;;  %vm68_vm2 = vweird.f32 %v47_v3  ;;  %v72_v14 = vand.u32 2147483647, %v47_v3 }
  0x10   :  { %v60_v18 = vor.u32 1.1754944e-38, %v59_v7  ;;  %vm58_vm5 = vcmp.eq.f32.partialorder %v57_v10, 8.507059e+37 }
  0x11   :  { %v75_v22 = vor.u32 1.1754944e-38, %v74_v11  ;;  %vm73_vm7 = vcmp.eq.f32.partialorder %v72_v14, 8.507059e+37 }
  0x14   :  { %v102_v4 = vpop.eup %101 }
  0x15   :  { %v104_v5 = vpop.eup %103  ;;  %v49_v6 = vmul.f32 %v102_v4, %v46_v1  ;;  %vm54_vm1 = vweird.f32 %v102_v4 }
  0x16   :  { %v64_v8 = vmul.f32 %v104_v5, %v47_v3  ;;  %vm69_vm3 = vweird.f32 %v104_v5  ;;  %vm207_vm4 = vmor %vm53_vm0, %vm54_vm1 }
  0x17   :  { %v50_v9 = vsub.f32 1.0, %v49_v6  ;;  %vm70_vm6 = vmor %vm68_vm2, %vm69_vm3 }
  0x18   :  { %v65_v13 = vsub.f32 1.0, %v64_v8 }
  0x19   :  { %v51_v15 = vmul.f32 %v102_v4, %v50_v9 }
  0x1a   :  { %v66_v19 = vmul.f32 %v104_v5, %v65_v13 }
  0x1b   :  { %v52_v21 = vadd.f32 %v102_v4, %v51_v15 }
  0x1c   :  { %v67_v24 = vadd.f32 %v104_v5, %v66_v19 }
  0x1d   :  { %v56_v25 = vsel %vm207_vm4, %v102_v4, %v52_v21 }
  0x1e   :  { %v61_v26 = vsel %vm58_vm5, %v60_v18, %v56_v25  ;;  %v71_v27 = vsel %vm70_vm6, %v104_v5, %v67_v24 }
  0x1f   :  { %v62_v28 = vmul.f32 %v61_v26, %v42_v20  ;;  %v76_v29 = vsel %vm73_vm7, %v75_v22, %v71_v27 }
  0x20   :  { %v77_v30 = vmul.f32 %v76_v29, %v43_v23 }
  0x21   :  { %78 = vst [vmem:[#allocation7] sm:$0xff] %v62_v28 }
  0x22   :  { %79 = vst [vmem:[#allocation7 + $0x8] sm:$0xff] %v77_v30 }
  0x23   :  { %90 = dma.vmem_to_hbm [thread:$0]  %s86_s1, 256, %s88_s21, [#allocation4]  }
  0x24   :  { %181 = dma.done.wait [#allocation4], 256  }
  0x25   :  { %182 = vsyncadd [#allocation4], 4294967040 }
  0x26   :  { %95 = vsyncpa [#allocation3], 1 }
  0x27   :  { %96 = vsyncpa [#allocation6], 1 }
  0x28   :  { %97 = vsyncpa [#allocation4], 1 }

</bundles_post_ra>
